<compile_context>
chip_gen: v7x
topology: tpu7x:2x2x1
jax: 0.10.0
libtpu: 0.0.40
codegen_flags: <defaults>
</compile_context>

<pallas_src>
import jax
import jax.numpy as jnp
from jax.experimental import pallas as pl
from jax.experimental.pallas import tpu as pltpu

# ------------------------- configuration (matches __init__) -----------------
B = 2
C = 32                    # channel
REDUCTION = 16
SQ = C // REDUCTION       # squeeze width = 2
H = 16
W = 16
HW = H * W                # 256 -> lane-dense (multiple of 128)


# ------------------------------- kernel --------------------------------------
def _se_kernel(x_ref, w1_ref, w2_ref, o_ref):
    x = x_ref[...]                                    # (B, C, HW)  f32, VMEM

    # ---- squeeze: global average pool over the spatial (lane) axis ----------
    p = jnp.mean(x, axis=-1)                          # (B, C)

    # ---- excitation: fc1 -> relu -> fc2, done on the VPU (no MXU) -----------
    w1 = w1_ref[...]                                  # (SQ, C)  = Linear(C, C//r).weight
    w2 = w2_ref[...]                                  # (C, SQ)  = Linear(C//r, C).weight
    gate = jnp.zeros_like(p)                          # (B, C)
    for i in range(SQ):                               # SQ = 2, statically unrolled
        hi = jnp.sum(p * w1[i][None, :], axis=-1, keepdims=True)   # (B, 1)
        hi = jnp.maximum(hi, 0.0)                     # ReLU per hidden unit
        gate = gate + hi * w2[:, i][None, :]          # (B, 1) * (1, C) -> (B, C)

    # ---- sigmoid gate (EUP exp) ----------------------------------------------
    s = 1.0 / (1.0 + jnp.exp(-gate))                  # (B, C)

    # ---- scale: broadcast the per-(batch, channel) gate over all lanes -------
    o_ref[...] = x * s[:, :, None]                    # (B, C, HW)


# ------------------------------- wrapper --------------------------------------
def se_layer(x, w1, w2):
    """x: (B, C, H, W) f32; w1: (C//r, C); w2: (C, C//r) -> (B, C, H, W)."""
    b, c, h, w = x.shape
    x3 = x.reshape(b, c, h * w)                       # contiguous, free reshape
    out = pl.pallas_call(
        _se_kernel,
        out_shape=jax.ShapeDtypeStruct((b, c, h * w), jnp.float32),
        in_specs=[
            pl.BlockSpec(memory_space=pltpu.MemorySpace.VMEM),   # x (whole array)
            pl.BlockSpec(memory_space=pltpu.MemorySpace.VMEM),   # w1
            pl.BlockSpec(memory_space=pltpu.MemorySpace.VMEM),   # w2
        ],
        out_specs=pl.BlockSpec(memory_space=pltpu.MemorySpace.VMEM),
    )(x3, w1, w2)
    return out.reshape(b, c, h, w)


# --------------------------- pure-JAX reference --------------------------------
def _se_reference(x, w1, w2):
    p = jnp.mean(x, axis=(2, 3))                      # (B, C)
    hdn = jnp.maximum(p @ w1.T, 0.0)                  # (B, SQ)
    s = 1.0 / (1.0 + jnp.exp(-(hdn @ w2.T)))          # (B, C)
    return x * s[:, :, None, None]


if __name__ == "__main__":
    key = jax.random.PRNGKey(0)
    kx, k1, k2 = jax.random.split(key, 3)
    x = jax.random.normal(kx, (B, C, H, W), dtype=jnp.float32)
    w1 = (0.1 * jax.random.normal(k1, (SQ, C))).astype(jnp.float32)   # Linear(C, C//r, bias=False).weight
    w2 = (0.1 * jax.random.normal(k2, (C, SQ))).astype(jnp.float32)   # Linear(C//r, C, bias=False).weight

    fwd = jax.jit(se_layer)
    out = jax.block_until_ready(fwd(x, w1, w2))

    ref = _se_reference(x, w1, w2)
    assert out.shape == (B, C, H, W), out.shape
    assert bool(jnp.all(jnp.isfinite(out)))
    assert bool(jnp.allclose(out, ref, atol=1e-5, rtol=1e-5)), float(jnp.max(jnp.abs(out - ref)))
    print("KERNEL_OK")
</pallas_src>

<mosaic_0001>
module attributes {stable_mosaic.version = 11 : i64} {
  func.func @_se_kernel(%arg0: memref<2x32x256xf32, #tpu.memory_space<vmem>>, %arg1: memref<2x32xf32, #tpu.memory_space<vmem>>, %arg2: memref<32x2xf32, #tpu.memory_space<vmem>>, %arg3: memref<2x32x256xf32, #tpu.memory_space<vmem>>) attributes {dimension_semantics = [], scalar_prefetch = 0 : i64, scratch_operands = 0 : i64, tpu.core_type = #tpu.core_type<tc>} {
    %c0 = arith.constant 0 : index
    %c0_0 = arith.constant 0 : index
    %c0_1 = arith.constant 0 : index
    %0 = vector.load %arg0[%c0, %c0_0, %c0_1] : memref<2x32x256xf32, #tpu.memory_space<vmem>>, vector<2x32x256xf32>
    %cst = arith.constant dense<0.000000e+00> : vector<2x32xf32>
    %1 = vector.multi_reduction <add>, %0, %cst [2] : vector<2x32x256xf32> to vector<2x32xf32>
    %cst_2 = arith.constant 2.560000e+02 : f32
    %2 = vector.broadcast %cst_2 : f32 to vector<2x32xf32>
    %3 = arith.divf %1, %2 : vector<2x32xf32>
    %c0_3 = arith.constant 0 : index
    %c0_4 = arith.constant 0 : index
    %4 = vector.load %arg1[%c0_3, %c0_4] : memref<2x32xf32, #tpu.memory_space<vmem>>, vector<2x32xf32>
    %c0_5 = arith.constant 0 : index
    %c0_6 = arith.constant 0 : index
    %5 = vector.load %arg2[%c0_5, %c0_6] : memref<32x2xf32, #tpu.memory_space<vmem>>, vector<32x2xf32>
    %cst_7 = arith.constant 0.000000e+00 : f32
    %6 = vector.broadcast %cst_7 : f32 to vector<2x32xf32>
    %7 = vector.extract_strided_slice %4 {offsets = [0, 0], sizes = [1, 32], strides = [1, 1]} : vector<2x32xf32> to vector<1x32xf32>
    %8 = vector.shape_cast %7 : vector<1x32xf32> to vector<32xf32>
    %9 = vector.shape_cast %8 : vector<32xf32> to vector<1x32xf32>
    %10 = vector.broadcast %9 : vector<1x32xf32> to vector<2x32xf32>
    %11 = arith.mulf %3, %10 : vector<2x32xf32>
    %cst_8 = arith.constant dense<0.000000e+00> : vector<2xf32>
    %12 = vector.multi_reduction <add>, %11, %cst_8 [1] : vector<2x32xf32> to vector<2xf32>
    %13 = vector.shape_cast %12 : vector<2xf32> to vector<2x1xf32>
    %cst_9 = arith.constant 0.000000e+00 : f32
    %14 = vector.broadcast %cst_9 : f32 to vector<2x1xf32>
    %15 = arith.maximumf %13, %14 : vector<2x1xf32>
    %16 = vector.extract_strided_slice %5 {offsets = [0, 0], sizes = [32, 1], strides = [1, 1]} : vector<32x2xf32> to vector<32x1xf32>
    %17 = vector.shape_cast %16 : vector<32x1xf32> to vector<32xf32>
    %18 = vector.shape_cast %17 : vector<32xf32> to vector<1x32xf32>
    %19 = vector.broadcast %15 : vector<2x1xf32> to vector<2x32xf32>
    %20 = vector.broadcast %18 : vector<1x32xf32> to vector<2x32xf32>
    %21 = arith.mulf %19, %20 : vector<2x32xf32>
    %22 = arith.addf %6, %21 : vector<2x32xf32>
    %23 = vector.extract_strided_slice %4 {offsets = [1, 0], sizes = [1, 32], strides = [1, 1]} : vector<2x32xf32> to vector<1x32xf32>
    %24 = vector.shape_cast %23 : vector<1x32xf32> to vector<32xf32>
    %25 = vector.shape_cast %24 : vector<32xf32> to vector<1x32xf32>
    %26 = vector.broadcast %25 : vector<1x32xf32> to vector<2x32xf32>
    %27 = arith.mulf %3, %26 : vector<2x32xf32>
    %cst_10 = arith.constant dense<0.000000e+00> : vector<2xf32>
    %28 = vector.multi_reduction <add>, %27, %cst_10 [1] : vector<2x32xf32> to vector<2xf32>
    %29 = vector.shape_cast %28 : vector<2xf32> to vector<2x1xf32>
    %cst_11 = arith.constant 0.000000e+00 : f32
    %30 = vector.broadcast %cst_11 : f32 to vector<2x1xf32>
    %31 = arith.maximumf %29, %30 : vector<2x1xf32>
    %32 = vector.extract_strided_slice %5 {offsets = [0, 1], sizes = [32, 1], strides = [1, 1]} : vector<32x2xf32> to vector<32x1xf32>
    %33 = vector.shape_cast %32 : vector<32x1xf32> to vector<32xf32>
    %34 = vector.shape_cast %33 : vector<32xf32> to vector<1x32xf32>
    %35 = vector.broadcast %31 : vector<2x1xf32> to vector<2x32xf32>
    %36 = vector.broadcast %34 : vector<1x32xf32> to vector<2x32xf32>
    %37 = arith.mulf %35, %36 : vector<2x32xf32>
    %38 = arith.addf %22, %37 : vector<2x32xf32>
    %cst_12 = arith.constant 0.000000e+00 : f32
    %39 = vector.broadcast %cst_12 : f32 to vector<2x32xf32>
    %40 = arith.subf %39, %38 : vector<2x32xf32>
    %41 = math.exp %40 : vector<2x32xf32>
    %cst_13 = arith.constant 1.000000e+00 : f32
    %42 = vector.broadcast %cst_13 : f32 to vector<2x32xf32>
    %43 = arith.addf %42, %41 : vector<2x32xf32>
    %cst_14 = arith.constant 1.000000e+00 : f32
    %44 = vector.broadcast %cst_14 : f32 to vector<2x32xf32>
    %45 = arith.divf %44, %43 : vector<2x32xf32>
    %46 = vector.shape_cast %45 : vector<2x32xf32> to vector<2x32x1xf32>
    %47 = vector.broadcast %46 : vector<2x32x1xf32> to vector<2x32x256xf32>
    %48 = arith.mulf %0, %47 : vector<2x32x256xf32>
    %c0_15 = arith.constant 0 : index
    %c0_16 = arith.constant 0 : index
    %c0_17 = arith.constant 0 : index
    %49 = vector.load %arg3[%c0_15, %c0_16, %c0_17] : memref<2x32x256xf32, #tpu.memory_space<vmem>>, vector<2x32x256xf32>
    tpu.vector_store %arg3[%c0_15, %c0_16, %c0_17], %48 {strides = array<i32>} : memref<2x32x256xf32, #tpu.memory_space<vmem>>, vector<2x32x256xf32>,
    return
  }
}

</mosaic_0001>

<bundles_post_ra>
// kernel: se_layer.1
= control target key start
LH: loop header
LB: loop body
LE: loop exit
PB: predicated region body
PF: predicated region fallthrough
CT: control target
= control target key end

     0   :  { %v68_v24 = vlaneseq  ;;  %v460_v31 = vmov 0   ;;  %vm143_vm0 = vcmask 130112   ;;  %vm150_vm1 = vcmask 195712   ;;  %s729_s0 = inlined_call_operand.vmem [shape: f32[2,32,256], index: 0, kind: input, shape index: {}]   ;;  %s730_s1 = inlined_call_operand.vmem [shape: f32[2,32], index: 1, kind: input, shape index: {}]   ;;  %s731_s2 = inlined_call_operand.vmem [shape: f32[32,2], index: 2, kind: input, shape index: {}]   ;;  %s732_s3 = inlined_call_operand.vmem [shape: f32[2,32,256], index: 3, kind: output, shape index: {}]  }
   0x1   :  { %v485_v0 = vld [vmem:[%s729_s0 + $0x40] sm:$0xff]  ;;  %v490_v1 = vld [vmem:[%s729_s0 + $0x48] sm:$0xff]  ;;  %v507_v5 = vld [vmem:[%s729_s0 + $0x50] sm:$0xff]  ;;  %449 = vset.pattern.permute.xlu1 %v460_v31  ;;  %448 = vset.pattern.permute.xlu0 %v460_v31  ;;  %vm157_vm2 = vcmask 261312   ;;  %vm178_vm3 = vcmask 1041409   ;;  %vm181_vm4 = vcmask 254976  }
   0x2   :  { %v495_v2 = vld [vmem:[%s729_s0] sm:$0xff]  ;;  %v42_v3 = vadd.f32 %v490_v1, %v485_v0  ;;  %v502_v4 = vld [vmem:[%s729_s0 + $0x8] sm:$0xff]  ;;  %v512_v6 = vld [vmem:[%s729_s0 + $0x58] sm:$0xff]  ;;  %v579_v25 = vshrl.u32 %v68_v24, 7 }
   0x3   :  { %v30_v7 = vadd.f32 %v502_v4, %v495_v2  ;;  %v519_v8 = vld [vmem:[%s729_s0 + $0x10] sm:$0xff]  ;;  %v524_v9 = vld [vmem:[%s729_s0 + $0x18] sm:$0xff]  ;;  %v45_v10 = vadd.f32 %v512_v6, %v507_v5  ;;  %v533_v12 = vld [vmem:[%s729_s0 + $0x60] sm:$0xff] }
   0x4   :  { %43 = vadd.xlane.f32.xlu1 %v42_v3  ;;  %v33_v11 = vadd.f32 %v524_v9, %v519_v8  ;;  %v538_v13 = vld [vmem:[%s729_s0 + $0x68] sm:$0xff]  ;;  %v543_v14 = vld [vmem:[%s729_s0 + $0x20] sm:$0xff]  ;;  %v557_v18 = vld [vmem:[%s729_s0 + $0x70] sm:$0xff]  ;;  %v70_v26 = vsub.s32 0, %v579_v25  ;;  %v226_v29 = vsub.s32 1, %v579_v25 }
   0x5   :  { %31 = vadd.xlane.f32.xlu0 %v30_v7  ;;  %v548_v15 = vld [vmem:[%s729_s0 + $0x28] sm:$0xff]  ;;  %v48_v16 = vadd.f32 %v538_v13, %v533_v12  ;;  %v562_v19 = vld [vmem:[%s729_s0 + $0x78] sm:$0xff]  ;;  %v567_v20 = vld [vmem:[%s729_s0 + $0x30] sm:$0xff] }
   0x6   :  { %v36_v17 = vadd.f32 %v548_v15, %v543_v14  ;;  %v572_v21 = vld [vmem:[%s729_s0 + $0x38] sm:$0xff]  ;;  %v51_v22 = vadd.f32 %v562_v19, %v557_v18  ;;  %v63_v27 = vld [vmem:[%s730_s1] sm:$0x3] }
   0x7   :  { %v39_v23 = vadd.f32 %v572_v21, %v567_v20  ;;  %v71_v28 = vrot.slane %v63_v27, %v70_v26  ;;  %v227_v30 = vrot.slane %v63_v27, %v226_v29  ;;  %v65_v27 = vld [vmem:[%s731_s2 + $0x8] sm:$0xff] }
   0x8   :  { %46 = vadd.xlane.f32.xlu1 %v45_v10 }
   0x9   :  { %34 = vadd.xlane.f32.xlu0 %v33_v11 }
   0xc   :  { %49 = vadd.xlane.f32.xlu1 %v48_v16 }
   0xd   :  { %37 = vadd.xlane.f32.xlu0 %v36_v17 }
  0x10   :  { %52 = vadd.xlane.f32.xlu1 %v51_v22 }
  0x11   :  { %40 = vadd.xlane.f32.xlu0 %v39_v23 }
  0x21   :  { %78 = vbcast.lane.b32.xlu1 %v71_v28, 264 }
  0x25   :  { %230 = vbcast.lane.b32.xlu1 %v227_v30, 256 }
  0x27   :  { %74 = vbcast.lane.b32.xlu0 %v71_v28, 256 }
  0x29   :  { %234 = vbcast.lane.b32.xlu1 %v227_v30, 264 }
  0x2b   :  { %82 = vbcast.lane.b32.xlu0 %v71_v28, 272 }
  0x2d   :  { %238 = vbcast.lane.b32.xlu1 %v227_v30, 272 }
  0x2f   :  { %86 = vbcast.lane.b32.xlu0 %v71_v28, 280  ;;  %v461_v28 = vmov 1  }
  0x31   :  { %242 = vbcast.lane.b32.xlu1 %v227_v30, 280  ;;  %v64_v30 = vld [vmem:[%s731_s2] sm:$0xff] }
  0x91   :  { %v44_v32 = vpop.xlane.xlu1 %43 }
  0x92   :  { %v32_v33 = vpop.xlane.xlu0 %31  ;;  %v59_v46 = vmul.f32 0.00390625, %v44_v32  ;;  %v66_v32 = vld [vmem:[%s731_s2 + $0x10] sm:$0xff] }
  0x93   :  { %v55_v41 = vmul.f32 0.00390625, %v32_v33 }
  0x95   :  { %v47_v34 = vpop.xlane.xlu1 %46 }
  0x96   :  { %v35_v35 = vpop.xlane.xlu0 %34  ;;  %v60_v47 = vmul.f32 0.00390625, %v47_v34 }
  0x97   :  { %v56_v40 = vmul.f32 0.00390625, %v35_v35 }
  0x99   :  { %v50_v36 = vpop.xlane.xlu1 %49 }
  0x9a   :  { %v38_v37 = vpop.xlane.xlu0 %37  ;;  %v61_v58 = vmul.f32 0.00390625, %v50_v36 }
  0x9b   :  { %v57_v57 = vmul.f32 0.00390625, %v38_v37  ;;  %v133_v37 = vand.u32 127, %v68_v24 }
  0x9d   :  { %v53_v38 = vpop.xlane.xlu1 %52 }
  0x9e   :  { %v41_v39 = vpop.xlane.xlu0 %40  ;;  %v62_v10 = vmul.f32 0.00390625, %v53_v38 }
  0x9f   :  { %v58_v7 = vmul.f32 0.00390625, %v41_v39 }
  0xa1   :  { %v79_v42 = vpop.permute.xlu1 %78 }
  0xa2   :  { %v93_v43 = vmul.f32 %v79_v42, %v56_v40  ;;  %v75_v44 = vpop.permute.xlu0 %74  ;;  %v97_v50 = vmul.f32 %v79_v42, %v60_v47 }
  0xa3   :  { %v92_v45 = vmul.f32 %v75_v44, %v55_v41  ;;  %v96_v49 = vmul.f32 %v75_v44, %v59_v46 }
  0xa4   :  { %112 = vperm.xlu1 %449, %v93_v43   ;;  %v145_v43 = vadd.s32 4294967280, %v133_v37 }
  0xa5   :  { %109 = vperm.xlu0 %448, %v92_v45   ;;  %v231_v48 = vpop.permute.xlu1 %230 }
  0xa6   :  { %v248_v52 = vmul.f32 %v231_v48, %v55_v41  ;;  %v252_v54 = vmul.f32 %v231_v48, %v59_v46  ;;  %v83_v55 = vpop.permute.xlu0 %82  ;;  %v612_v48 = vsub.s32 %v145_v43, %v579_v25 }
  0xa7   :  { %v94_v59 = vmul.f32 %v83_v55, %v57_v57  ;;  %v98_v60 = vmul.f32 %v83_v55, %v61_v58 }
  0xa8   :  { %121 = vperm.xlu1 %449, %v96_v49  }
  0xa9   :  { %124 = vperm.xlu0 %448, %v97_v50   ;;  %v235_v51 = vpop.permute.xlu1 %234 }
  0xaa   :  { %v249_v53 = vmul.f32 %v235_v51, %v56_v40  ;;  %v253_v56 = vmul.f32 %v235_v51, %v60_v47  ;;  %v87_v63 = vpop.permute.xlu0 %86  ;;  %v138_v40 = vadd.s32 4294967288, %v133_v37  ;;  %v152_v47 = vadd.s32 4294967272, %v133_v37 }
  0xab   :  { %v95_v11 = vmul.f32 %v87_v63, %v58_v7  ;;  %v99_v16 = vmul.f32 %v87_v63, %v62_v10 }
  0xac   :  { %265 = vperm.xlu1 %449, %v248_v52   ;;  %v608_v44 = vsub.s32 %v138_v40, %v579_v25 }
  0xad   :  { %268 = vperm.xlu0 %448, %v249_v53   ;;  %v239_v61 = vpop.permute.xlu1 %238 }
  0xae   :  { %v250_v62 = vmul.f32 %v239_v61, %v57_v57  ;;  %v254_v3 = vmul.f32 %v239_v61, %v61_v58 }
  0xb0   :  { %277 = vperm.xlu1 %449, %v252_v54   ;;  %v617_v54 = vsub.s32 %v152_v47, %v579_v25 }
  0xb1   :  { %280 = vperm.xlu0 %448, %v253_v56   ;;  %v243_v17 = vpop.permute.xlu1 %242 }
  0xb2   :  { %v251_v22 = vmul.f32 %v243_v17, %v58_v7  ;;  %v255_v23 = vmul.f32 %v243_v17, %v62_v10 }
  0xb4   :  { %115 = vperm.xlu1 %449, %v94_v59  }
  0xb5   :  { %127 = vperm.xlu0 %448, %v98_v60  }
  0xb8   :  { %271 = vperm.xlu1 %449, %v250_v62  }
  0xb9   :  { %283 = vperm.xlu0 %448, %v254_v3  }
  0xbc   :  { %118 = vperm.xlu1 %449, %v95_v11  }
  0xbd   :  { %130 = vperm.xlu0 %448, %v99_v16  }
  0xc0   :  { %274 = vperm.xlu1 %449, %v251_v22  }
  0xc1   :  { %286 = vperm.xlu0 %448, %v255_v23  }
  0xc4   :  { %194 = vperm.xlu1 %449, %v65_v27  }
  0xc5   :  { %451 = vset.pattern.permute.xlu0 %v461_v28 }
  0xc6   :  { %336 = vperm.xlu0 %451, %v65_v27  }
  0xc8   :  { %450 = vset.pattern.permute.xlu1 %v461_v28 }
  0xc9   :  { %333 = vperm.xlu1 %450, %v64_v30  }
  0xca   :  { %452 = vset.pattern.permute.xlu0 %v460_v31 }
  0xcb   :  { %191 = vperm.xlu0 %452, %v64_v30  }
  0xcd   :  { %453 = vset.pattern.permute.xlu1 %v460_v31  ;;  %v136_v31 = vsub.s32 %v133_v37, %v579_v25 }
  0xce   :  { %197 = vperm.xlu1 %453, %v66_v32  }
  0xd2   :  { %454 = vset.pattern.permute.xlu1 %v461_v28 }
  0xd3   :  { %339 = vperm.xlu1 %454, %v66_v32  }
 0x123   :  { %v113_v33 = vpop.permute.xlu1 %112 }
 0x124   :  { %v110_v34 = vpop.permute.xlu0 %109  ;;  %v142_v49 = vrot.slane %v113_v33, %v608_v44 }
 0x125   :  { %v137_v24 = vrot.slane %v110_v34, %v136_v31 }
 0x127   :  { %v122_v35 = vpop.permute.xlu1 %121  ;;  %v144_v57 = vsel %vm143_vm0, %v142_v49, %v137_v24 }
 0x128   :  { %v125_v36 = vpop.permute.xlu0 %124  ;;  %v162_v50 = vrot.slane %v122_v35, %v136_v31 }
 0x129   :  { %v166_v51 = vrot.slane %v125_v36, %v608_v44 }
 0x12b   :  { %v266_v38 = vpop.permute.xlu1 %265  ;;  %v167_v58 = vsel %vm143_vm0, %v166_v51, %v162_v50 }
 0x12c   :  { %v269_v39 = vpop.permute.xlu0 %268  ;;  %v291_v60 = vrot.slane %v266_v38, %v136_v31 }
 0x12d   :  { %v295_v61 = vrot.slane %v269_v39, %v608_v44 }
 0x12f   :  { %v278_v41 = vpop.permute.xlu1 %277  ;;  %v296_v32 = vsel %vm143_vm0, %v295_v61, %v291_v60  ;;  %v67_v60 = vld [vmem:[%s731_s2 + $0x18] sm:$0xff] }
 0x130   :  { %v281_v42 = vpop.permute.xlu0 %280  ;;  %v310_v62 = vrot.slane %v278_v41, %v136_v31 }
 0x131   :  { %v314_v7 = vrot.slane %v281_v42, %v608_v44 }
 0x133   :  { %v116_v45 = vpop.permute.xlu1 %115  ;;  %v315_v36 = vsel %vm143_vm0, %v314_v7, %v310_v62 }
 0x134   :  { %v128_v46 = vpop.permute.xlu0 %127  ;;  %v149_v55 = vrot.slane %v116_v45, %v612_v48 }
 0x135   :  { %v171_v56 = vrot.slane %v128_v46, %v612_v48 }
 0x136   :  { %v151_v10 = vsel %vm150_vm1, %v149_v55, %v144_v57 }
 0x137   :  { %v272_v52 = vpop.permute.xlu1 %271  ;;  %v172_v17 = vsel %vm150_vm1, %v171_v56, %v167_v58 }
 0x138   :  { %v284_v53 = vpop.permute.xlu0 %283  ;;  %v300_v11 = vrot.slane %v272_v52, %v612_v48 }
 0x139   :  { %v319_v22 = vrot.slane %v284_v53, %v612_v48 }
 0x13a   :  { %v301_v37 = vsel %vm150_vm1, %v300_v11, %v296_v32 }
 0x13b   :  { %v119_v59 = vpop.permute.xlu1 %118  ;;  %v320_v40 = vsel %vm150_vm1, %v319_v22, %v315_v36 }
 0x13c   :  { %v156_v63 = vrot.slane %v119_v59, %v617_v54  ;;  %v131_v3 = vpop.permute.xlu0 %130 }
 0x13d   :  { %v176_v16 = vrot.slane %v131_v3, %v617_v54 }
 0x13e   :  { %v158_v23 = vsel %vm157_vm2, %v156_v63, %v151_v10 }
 0x13f   :  { %v275_v27 = vpop.permute.xlu1 %274  ;;  %v177_v30 = vsel %vm157_vm2, %v176_v16, %v172_v17 }
 0x140   :  { %v305_v33 = vrot.slane %v275_v27, %v617_v54  ;;  %v287_v34 = vpop.permute.xlu0 %286  ;;  %v179_v35 = vsel %vm178_vm3, %v177_v30, %v158_v23 }
 0x141   :  { %v324_v38 = vrot.slane %v287_v34, %v617_v54  ;;  %v182_v39 = vsel %vm181_vm4, %v179_v35, 0.0 }
 0x142   :  { %183 = vadd.xlane.f32.xlu1 %v182_v39  ;;  %v306_v41 = vsel %vm157_vm2, %v305_v33, %v301_v37 }
 0x143   :  { %v325_v42 = vsel %vm157_vm2, %v324_v38, %v320_v40  ;;  %v195_v43 = vpop.permute.xlu1 %194 }
 0x144   :  { %v326_v45 = vsel %vm178_vm3, %v325_v42, %v306_v41  ;;  %v209_v52 = vrot.slane %v195_v43, %v608_v44 }
 0x145   :  { %v328_v46 = vsel %vm181_vm4, %v326_v45, 0.0  ;;  %v337_v47 = vpop.permute.xlu0 %336 }
 0x146   :  { %329 = vadd.xlane.f32.xlu0 %v328_v46  ;;  %v351_v49 = vrot.slane %v337_v47, %v608_v44 }
 0x148   :  { %v334_v24 = vpop.permute.xlu1 %333 }
 0x149   :  { %v347_v50 = vrot.slane %v334_v24, %v136_v31 }
 0x14a   :  { %v192_v51 = vpop.permute.xlu0 %191 }
 0x14b   :  { %v352_v53 = vsel %vm143_vm0, %v351_v49, %v347_v50  ;;  %v205_v55 = vrot.slane %v192_v51, %v136_v31 }
 0x14d   :  { %v210_v56 = vsel %vm143_vm0, %v209_v52, %v205_v55  ;;  %v198_v57 = vpop.permute.xlu1 %197 }
 0x14e   :  { %v214_v58 = vrot.slane %v198_v57, %v612_v48 }
 0x150   :  { %v215_v59 = vsel %vm150_vm1, %v214_v58, %v210_v56 }
 0x152   :  { %v340_v61 = vpop.permute.xlu1 %339 }
 0x153   :  { %342 = vperm.xlu1 %454, %v67_v60   ;;  %v356_v62 = vrot.slane %v340_v61, %v612_v48 }
 0x155   :  { %v357_v44 = vsel %vm150_vm1, %v356_v62, %v352_v53 }
 0x15c   :  { %200 = vperm.xlu0 %452, %v67_v60  }
 0x160   :  { %455 = vset.pattern.permute.xlu0 %v461_v28 }
 0x1cf   :  { %v184_v31 = vpop.xlane.xlu1 %183 }
 0x1d0   :  { %v185_v22 = vmax.f32 %v184_v31, 0.0 }
 0x1d3   :  { %v343_v63 = vpop.permute.xlu1 %342  ;;  %v330_v3 = vpop.xlane.xlu0 %329 }
 0x1d4   :  { %v361_v7 = vrot.slane %v343_v63, %v617_v54  ;;  %v331_v10 = vmax.f32 %v330_v3, 0.0 }
 0x1d6   :  { %v362_v16 = vsel %vm157_vm2, %v361_v7, %v357_v44 }
 0x1d7   :  { %v364_v48 = vmul.f32 %v362_v16, %v331_v10 }
 0x1db   :  { %v201_v11 = vpop.permute.xlu0 %200 }
 0x1dc   :  { %v219_v17 = vrot.slane %v201_v11, %v617_v54 }
 0x1de   :  { %v220_v23 = vsel %vm157_vm2, %v219_v17, %v215_v59 }
 0x1df   :  { %v222_v27 = vmul.f32 %v220_v23, %v185_v22 }
 0x1e1   :  { %v365_v30 = vadd.f32 %v364_v48, %v222_v27 }
 0x1e3   :  { %v366_v32 = vsub.f32 0.0, %v365_v30 }
 0x1e5   :  { %v367_v33 = vmul.f32 1.442695, %v366_v32 }
 0x1e7   :  { %456 = vpow2.f32 %v367_v33 }
 0x1f1   :  { %v457_v28 = vpop.eup %456 }
 0x1f2   :  { %v369_v34 = vadd.f32 1.0, %v457_v28 }
 0x1f4   :  { %458 = vrcp.f32 %v369_v34 }
 0x1fe   :  { %v459_v35 = vpop.eup %458 }
 0x1ff   :  { %v375_v36 = vrot.slane %v459_v35, %v70_v26  ;;  %v394_v54 = vrot.slane %v459_v35, %v226_v29 }
 0x201   :  { %381 = vbcast.lane.b32.xlu0 %v375_v36, 264  ;;  %377 = vbcast.lane.b32.xlu1 %v375_v36, 256 }
 0x205   :  { %389 = vbcast.lane.b32.xlu0 %v375_v36, 280  ;;  %385 = vbcast.lane.b32.xlu1 %v375_v36, 272 }
 0x209   :  { %400 = vbcast.lane.b32.xlu0 %v394_v54, 264  ;;  %396 = vbcast.lane.b32.xlu1 %v394_v54, 256 }
 0x20d   :  { %408 = vbcast.lane.b32.xlu0 %v394_v54, 280  ;;  %404 = vbcast.lane.b32.xlu1 %v394_v54, 272 }
 0x273   :  { %v382_v37 = vpop.permute.xlu0 %381  ;;  %v378_v38 = vpop.permute.xlu1 %377 }
 0x274   :  { %v412_v39 = vmul.f32 %v382_v37, %v519_v8  ;;  %v413_v40 = vmul.f32 %v382_v37, %v524_v9  ;;  %v410_v41 = vmul.f32 %v378_v38, %v495_v2  ;;  %v411_v26 = vmul.f32 %v378_v38, %v502_v4 }
 0x276   :  { %428 = vst [vmem:[%s732_s3 + $0x10] sm:$0xff] %v412_v39  ;;  %429 = vst [vmem:[%s732_s3 + $0x18] sm:$0xff] %v413_v40 }
 0x277   :  { %426 = vst [vmem:[%s732_s3] sm:$0xff] %v410_v41  ;;  %427 = vst [vmem:[%s732_s3 + $0x8] sm:$0xff] %v411_v26  ;;  %v390_v8 = vpop.permute.xlu0 %389  ;;  %v386_v2 = vpop.permute.xlu1 %385 }
 0x278   :  { %v416_v4 = vmul.f32 %v390_v8, %v567_v20  ;;  %v417_v9 = vmul.f32 %v390_v8, %v572_v21  ;;  %v414_v25 = vmul.f32 %v386_v2, %v543_v14  ;;  %v415_v29 = vmul.f32 %v386_v2, %v548_v15 }
 0x27a   :  { %432 = vst [vmem:[%s732_s3 + $0x30] sm:$0xff] %v416_v4  ;;  %433 = vst [vmem:[%s732_s3 + $0x38] sm:$0xff] %v417_v9 }
 0x27b   :  { %430 = vst [vmem:[%s732_s3 + $0x20] sm:$0xff] %v414_v25  ;;  %431 = vst [vmem:[%s732_s3 + $0x28] sm:$0xff] %v415_v29  ;;  %v401_v20 = vpop.permute.xlu0 %400  ;;  %v397_v14 = vpop.permute.xlu1 %396 }
 0x27c   :  { %v420_v15 = vmul.f32 %v401_v20, %v507_v5  ;;  %v421_v21 = vmul.f32 %v401_v20, %v512_v6  ;;  %v418_v42 = vmul.f32 %v397_v14, %v485_v0  ;;  %v419_v43 = vmul.f32 %v397_v14, %v490_v1 }
 0x27e   :  { %436 = vst [vmem:[%s732_s3 + $0x50] sm:$0xff] %v420_v15  ;;  %437 = vst [vmem:[%s732_s3 + $0x58] sm:$0xff] %v421_v21 }
 0x27f   :  { %434 = vst [vmem:[%s732_s3 + $0x40] sm:$0xff] %v418_v42  ;;  %435 = vst [vmem:[%s732_s3 + $0x48] sm:$0xff] %v419_v43  ;;  %v409_v5 = vpop.permute.xlu0 %408  ;;  %v405_v0 = vpop.permute.xlu1 %404 }
 0x280   :  { %v424_v1 = vmul.f32 %v409_v5, %v557_v18  ;;  %v425_v6 = vmul.f32 %v409_v5, %v562_v19  ;;  %v422_v45 = vmul.f32 %v405_v0, %v533_v12  ;;  %v423_v46 = vmul.f32 %v405_v0, %v538_v13 }
 0x282   :  { %440 = vst [vmem:[%s732_s3 + $0x70] sm:$0xff] %v424_v1  ;;  %441 = vst [vmem:[%s732_s3 + $0x78] sm:$0xff] %v425_v6 }
 0x283   :  { %438 = vst [vmem:[%s732_s3 + $0x60] sm:$0xff] %v422_v45  ;;  %439 = vst [vmem:[%s732_s3 + $0x68] sm:$0xff] %v423_v46 }

</bundles_post_ra>
